<compile_context>
chip_gen: v6e
topology: v6e:2x2x1
jax: 0.10.0
libtpu: 0.0.40
codegen_flags: <defaults>
</compile_context>

<pallas_src>
import jax
import jax.numpy as jnp
from jax.experimental import pallas as pl
from jax.experimental.pallas import tpu as pltpu

# Padded tile sizes (real sizes: batch<=8, in=3(+1 bias col), hidden=3(+1), out=2)
B_PAD, IN_PAD, HID_PAD, OUT_PAD = 8, 8, 8, 128
W2_LANE_OFF = 128  # second-layer weights start on a lane-tile boundary in the slab

_VMEM_SPEC = pl.BlockSpec(memory_space=pltpu.MemorySpace.VMEM)


def sexnet_kernel(x_ref, w_ref, o_ref):
    """Fused MLP on padded tiles; biases are folded into the weight slab.

    x    : (B_PAD, IN_PAD)         cols 0..2 = features, col 3 = constant 1
    slab : (IN_PAD, 256)           lanes 0..7   = W1.T pad (row 3 = [b1, 1, 0...])
                                   lanes 128..255 = W2.T pad (row 3 = [b2, 0...])
    out  : (B_PAD, OUT_PAD)        cols 0..1 are the real logits
    """
    w1 = w_ref[:, :HID_PAD]                            # (IN_PAD, HID_PAD) static view
    w2 = w_ref[:, W2_LANE_OFF:W2_LANE_OFF + OUT_PAD]   # (HID_PAD, OUT_PAD) static view
    h = jnp.dot(x_ref[...], w1, preferred_element_type=jnp.float32)
    h = jnp.maximum(h, 0.0)  # ReLU; the constant-1 bias column passes through unchanged
    o_ref[...] = jnp.dot(h, w2, preferred_element_type=jnp.float32)


@jax.jit
def _forward_padded(xp, w_slab):
    """Fixed-shape fused forward: compiles exactly once for all batch sizes."""
    return pl.pallas_call(
        sexnet_kernel,
        out_shape=jax.ShapeDtypeStruct((B_PAD, OUT_PAD), jnp.float32),
        in_specs=[_VMEM_SPEC, _VMEM_SPEC],
        out_specs=_VMEM_SPEC,
    )(xp, w_slab)


def prepare_params(params):
    """One-time packing of torch-layout params into a single padded weight slab.

    Returns (w_slab, x_base):
      w_slab : (IN_PAD, 256) — both layers + folded biases
      x_base : (B_PAD, IN_PAD) — zero template with the constant-1 bias column
    """
    w1, b1, w2, b2 = (jnp.asarray(p, jnp.float32) for p in params)
    # w1 (3,3) out,in ; b1 (3,) ; w2 (2,3) out,in ; b2 (2,)
    slab = jnp.zeros((IN_PAD, W2_LANE_OFF + OUT_PAD), jnp.float32)
    # layer 1 region (lanes 0..HID_PAD-1)
    slab = slab.at[:3, :3].set(w1.T)
    slab = slab.at[3, :3].set(b1)
    slab = slab.at[3, 3].set(1.0)  # keeps the constant-1 column alive through ReLU
    # layer 2 region (lanes 128..)
    slab = slab.at[:3, W2_LANE_OFF:W2_LANE_OFF + 2].set(w2.T)
    slab = slab.at[3, W2_LANE_OFF:W2_LANE_OFF + 2].set(b2)
    # x template: constant-1 bias column, features scattered in per call
    x_base = jnp.zeros((B_PAD, IN_PAD), jnp.float32).at[:, 3].set(1.0)
    return slab, x_base


def sexnet_forward(x, packed_params):
    """Forward pass matching torch `sexnet`: x can be shape (3,) or (B, 3)."""
    w_slab, x_base = packed_params
    x = jnp.asarray(x, jnp.float32)
    squeeze = x.ndim == 1
    x2d = jnp.atleast_2d(x)  # (B, 3)
    B = x2d.shape[0]
    # TODO(synk): for B > 8, chunk the batch (or add a parallel batch grid: 256-row
    # tiles on v7x/v6e, 128 on v5e, bf16 operands on v6e/v7x) instead of asserting.
    assert B <= B_PAD and x2d.shape[1] == 3
    xp = x_base.at[:B, :3].set(x2d)     # tiny scatter into the fixed-shape template
    out = _forward_padded(xp, w_slab)   # single cached executable
    res = out[:B, :2]
    return res[0] if squeeze else res


def init_params(key):
    """Deterministic PyTorch-default-style init (uniform(-1/sqrt(fan_in), +))."""
    k1, k2, k3, k4 = jax.random.split(key, 4)
    bound1 = 1.0 / jnp.sqrt(3.0)  # fan_in = 3
    w1 = jax.random.uniform(k1, (3, 3), jnp.float32, -bound1, bound1)  # (out, in)
    b1 = jax.random.uniform(k2, (3,), jnp.float32, -bound1, bound1)
    bound2 = 1.0 / jnp.sqrt(3.0)  # fan_in = 3
    w2 = jax.random.uniform(k3, (2, 3), jnp.float32, -bound2, bound2)  # (out, in)
    b2 = jax.random.uniform(k4, (2,), jnp.float32, -bound2, bound2)
    return (w1, b1, w2, b2)


def sexnet_ref(x, params):
    """Pure-JAX reference of the torch forward pass."""
    w1, b1, w2, b2 = params
    h = jnp.maximum(x @ w1.T + b1, 0.0)
    return h @ w2.T + b2


if __name__ == "__main__":
    root = jax.random.PRNGKey(0)
    k_params, k_x, k_xb = jax.random.split(root, 3)

    params = init_params(k_params)
    packed = prepare_params(params)  # pad/pack weights ONCE, off the hot path

    # Example input mimicking torch.tensor([height/2, weight/80, waist/90]).
    x = jax.random.uniform(k_x, (3,), jnp.float32, 0.5, 2.5)
    out = jax.block_until_ready(sexnet_forward(x, packed))
    ref = sexnet_ref(x, params)
    assert out.shape == (2,), out.shape
    assert jnp.allclose(out, ref, atol=1e-5, rtol=1e-5), (out, ref)

    # Small-batch path reuses the SAME compiled kernel with B > 1.
    xb = jax.random.uniform(k_xb, (4, 3), jnp.float32, 0.5, 2.5)
    outb = jax.block_until_ready(sexnet_forward(xb, packed))
    refb = sexnet_ref(xb, params)
    assert outb.shape == (4, 2), outb.shape
    assert jnp.allclose(outb, refb, atol=1e-5, rtol=1e-5), (outb, refb)

    print("KERNEL_OK")
</pallas_src>

<mosaic_0001>
module attributes {stable_mosaic.version = 11 : i64} {
  func.func @sexnet_kernel(%arg0: memref<8x8xf32, #tpu.memory_space<vmem>>, %arg1: memref<8x256xf32, #tpu.memory_space<vmem>>, %arg2: memref<8x128xf32, #tpu.memory_space<vmem>>) attributes {dimension_semantics = [], scalar_prefetch = 0 : i64, scratch_operands = 0 : i64, tpu.core_type = #tpu.core_type<tc>} {
    %c0 = arith.constant 0 : index
    %c0_0 = arith.constant 0 : index
    %0 = vector.load %arg1[%c0, %c0_0] : memref<8x256xf32, #tpu.memory_space<vmem>>, vector<8x8xf32>
    %c0_1 = arith.constant 0 : index
    %c128 = arith.constant 128 : index
    %1 = vector.load %arg1[%c0_1, %c128] : memref<8x256xf32, #tpu.memory_space<vmem>>, vector<8x128xf32>
    %c0_2 = arith.constant 0 : index
    %c0_3 = arith.constant 0 : index
    %2 = vector.load %arg0[%c0_2, %c0_3] : memref<8x8xf32, #tpu.memory_space<vmem>>, vector<8x8xf32>
    %cst = arith.constant dense<0.000000e+00> : vector<8x8xf32>
    %3 = tpu.matmul %2, %0, %cst {dimension_numbers = #tpu.dot_dimension_numbers<[1], [0], [0], [1], [0, 0, 1, 1], [], []>} : vector<8x8xf32>, vector<8x8xf32>, vector<8x8xf32> -> vector<8x8xf32>
    %cst_4 = arith.constant 0.000000e+00 : f32
    %4 = vector.broadcast %cst_4 : f32 to vector<8x8xf32>
    %5 = arith.maximumf %3, %4 : vector<8x8xf32>
    %cst_5 = arith.constant dense<0.000000e+00> : vector<8x128xf32>
    %6 = tpu.matmul %5, %1, %cst_5 {dimension_numbers = #tpu.dot_dimension_numbers<[1], [0], [0], [1], [0, 0, 1, 1], [], []>} : vector<8x8xf32>, vector<8x128xf32>, vector<8x128xf32> -> vector<8x128xf32>
    %c0_6 = arith.constant 0 : index
    %c0_7 = arith.constant 0 : index
    %7 = vector.load %arg2[%c0_6, %c0_7] : memref<8x128xf32, #tpu.memory_space<vmem>>, vector<8x128xf32>
    tpu.vector_store %arg2[%c0_6, %c0_7], %6 {strides = array<i32>} : memref<8x128xf32, #tpu.memory_space<vmem>>, vector<8x128xf32>,
    return
  }
}

</mosaic_0001>

<bundles_post_ra>
// kernel: _forward_padded.1
= control target key start
LH: loop header
LB: loop body
LE: loop exit
PB: predicated region body
PF: predicated region fallthrough
CT: control target
= control target key end

     0   :  { %7 = vsyncpa [#allocation3], 0  ;;  %s320_s0 = inlined_call_operand.hbm [shape: f32[8,8], index: 0, kind: input, shape index: {}]   ;;  %s321_s1 = inlined_call_operand.hbm [shape: f32[8,256], index: 1, kind: input, shape index: {}]   ;;  %s322_s2 = inlined_call_operand.hbm [shape: f32[8,128], index: 2, kind: output, shape index: {}]  }
   0x1   :  { %8 = vsyncpa [#allocation6], 0 }
   0x2   :  { %9 = vsyncpa [#allocation4], 0  ;;  %s291_s9 = smov [#allocation2]   ;;  %s292_s11 = smov [#allocation5]  }
   0x3   :  { %s16_s10 = sshll.u32 %s291_s9, 4  ;;  %s26_s12 = sshll.u32 %s292_s11, 4  ;;  %s17_s10 = int_to_ptr.vmem [resolvable:$true] %s16_s10  ;;  %s27_s12 = int_to_ptr.vmem [resolvable:$true] %s26_s12 }
   0x4   :  { %s233_s13 = scalar_lea.vmem %s17_s10, 128  ;;  %p238_p1 = scmp.lt.s32.totalorder %s17_s10, %s17_s10 }
   0x5   :  { %p234_p0 = scmp.ne.s32.totalorder %s17_s10, %s233_s13  ;;  %p239_p2 = scmp.lt.s32.totalorder %s233_s13, %s233_s13 }
   0x7   :  { %p240_p3 = por %p239_p2, %p238_p1 }
   0x9   :  { %p241_p4 = pnand %p240_p3, %p234_p0 }
   0xb   :  { %244 = shalt.err (!%p241_p4)
}
   0xc   :  { %19 = dma.hbm_to_vmem [thread:$0]  %s320_s0, 128, %s17_s10, [#allocation3]  }
   0xd   :  { %s253_s16 = scalar_lea.vmem %s27_s12, 256  ;;  %p258_p6 = scmp.lt.s32.totalorder %s27_s12, %s27_s12 }
   0xe   :  { %p254_p5 = scmp.ne.s32.totalorder %s27_s12, %s253_s16  ;;  %p259_p7 = scmp.lt.s32.totalorder %s253_s16, %s253_s16 }
  0x10   :  { %p260_p8 = por %p259_p7, %p258_p6 }
  0x12   :  { %p261_p9 = pnand %p260_p8, %p254_p5 }
  0x14   :  { %264 = shalt.err (!%p261_p9)
}
  0x15   :  { %29 = dma.hbm_to_vmem [thread:$0]  %s321_s1, 256, %s27_s12, [#allocation6]  }
  0x16   :  { %285 = dma.done.wait [#allocation3], 128  }
  0x17   :  { %286 = vsyncadd [#allocation3], 4294967168 }
  0x18   :  { %287 = dma.done.wait [#allocation6], 256  }
  0x19   :  { %288 = vsyncadd [#allocation6], 4294967040  ;;  %v293_v0 = vmov 0.0   ;;  %vm294_vm0 = vmmov 0   ;;  %vm39_vm1 = vcmask 64512   ;;  %v36_v1 = vld [vmem:[#allocation5] sm:$0xff] }
  0x1a   :  { %210 = vmatprep.subr.mxu0 %v293_v0  ;;  %212 = vmatprep.mubr.msk.f32.mxu0 %vm294_vm0, %v293_v0  ;;  %v38_v2 = vld [vmem:[#allocation2] sm:$0xff]  ;;  %v37_v3 = vld [vmem:[#allocation5 + $0x8] sm:$0xff]  ;;  %s295_s0 = smov [#allocation7]  }
  0x1b   :  { %215 = vmatprep.subr.mxu1 %v293_v0  ;;  %217 = vmatprep.mubr.msk.f32.mxu1 %vm294_vm0, %v293_v0  ;;  %s194_s1 = sshll.u32 %s295_s0, 4  ;;  %s195_s1 = int_to_ptr.vmem [resolvable:$true] %s194_s1 }
  0x1c   :  { %211 = vmatpush3.msra.mxu0 %v36_v1  ;;  %216 = vmatpush3.msra.mxu1 %v37_v3  ;;  %s265_s19 = scalar_lea.vmem %s195_s1, 128  ;;  %p270_p11 = scmp.lt.s32.totalorder %s195_s1, %s195_s1 }
  0x1d   :  { %213 = vmatmul.mubr.msk.f32.vlgmr.msra.gmra.mxu0 %vm39_vm1, %v38_v2  ;;  %p266_p10 = scmp.ne.s32.totalorder %s195_s1, %s265_s19  ;;  %p271_p12 = scmp.lt.s32.totalorder %s265_s19, %s265_s19 }
  0x1f   :  { %p272_p13 = por %p271_p12, %p270_p11 }
  0x21   :  { %p273_p0 = pnand %p272_p13, %p266_p10 }
  0xdd   :  { %v109_v4 = vpop.f32.mrf.mxu0 }
  0xde   :  { %v113_v5 = vmax.f32 %v109_v4, 0.0 }
  0xdf   :  { %v214_v6 = vpop.f32.mrf.mxu0 }
  0xe0   :  { %218 = vmatmul.mubr.msk.f32.vlgmr.msra.gmra.mxu1 %vm39_vm1, %v113_v5 }
 0x1a0   :  { %v183_v7 = vpop.f32.mrf.mxu1 }
 0x1a1   :  { %187 = vst [vmem:[#allocation7] sm:$0xff] %v183_v7 }
 0x1a2   :  { %v219_v8 = vpop.f32.mrf.mxu1 }
 0x1a3   :  { %276 = shalt.err (!%p273_p0)
}
 0x1a4   :  { %197 = dma.vmem_to_hbm [thread:$0]  %s195_s1, 128, %s322_s2, [#allocation4]  }
 0x1a5   :  { %289 = dma.done.wait [#allocation4], 128  }
 0x1a6   :  { %290 = vsyncadd [#allocation4], 4294967168 }
 0x1a7   :  { %201 = vsyncpa [#allocation3], 1 }
 0x1a8   :  { %202 = vsyncpa [#allocation6], 1 }
 0x1a9   :  { %203 = vsyncpa [#allocation4], 1 }

</bundles_post_ra>
